<compile_context>
chip_gen: v6e
topology: v6e:2x2x1
jax: 0.10.0
libtpu: 0.0.40
codegen_flags: <defaults>
</compile_context>

<pallas_src>
import jax
import jax.numpy as jnp
from jax.experimental import pallas as pl
from jax.experimental.pallas import tpu as pltpu

_MIB = 1024 * 1024


def _round_up(x: int, m: int) -> int:
    return ((x + m - 1) // m) * m


def _tpu_info():
    """Returns (vmem_capacity_bytes, lane_align) with conservative fallbacks."""
    vmem_cap = 64 * _MIB        # v7x per-TC; conservative default
    lane = 256                  # v6e/v7x MXU is 2x256x256 -> 256-aligned N/K tiles
    try:
        kind = jax.devices()[0].device_kind.lower()
    except Exception:
        kind = ""
    if ("v4" in kind) or ("v5" in kind) or ("v6" in kind):
        vmem_cap = 128 * _MIB   # 128 MiB VMEM on v4/v5e/v5p/v6e
    if ("v2" in kind) or ("v3" in kind) or ("v4" in kind) or ("v5" in kind):
        lane = 128              # 128-wide MXU; 256-padding would only waste flops
    try:
        info = pltpu.get_tpu_info()
        vmem_cap = int(getattr(info, "vmem_capacity_bytes", vmem_cap))
    except Exception:
        pass
    return vmem_cap, lane


def jointnet_kernel(x_ref, w1_ref, b1_ref, w2_ref, b2_ref, w3_ref, b3_ref, o_ref):
    cdt = w2_ref.dtype
    # fc1: MXU matmul with f32 accumulate; bias + ReLU in f32, fused downcast.
    h1 = jnp.dot(x_ref[...], w1_ref[...], preferred_element_type=jnp.float32)
    h1 = jnp.maximum(h1 + b1_ref[...], 0.0).astype(cdt)
    # fc2
    h2 = jnp.dot(h1, w2_ref[...], preferred_element_type=jnp.float32)
    h2 = jnp.maximum(h2 + b2_ref[...], 0.0).astype(cdt)
    # fc3 (no activation)
    o = jnp.dot(h2, w3_ref[...], preferred_element_type=jnp.float32) + b3_ref[...]
    o_ref[...] = o.astype(o_ref.dtype)


def prepare_jointnet_params(w1, b1, w2, b2, w3, b3, *,
                            compute_dtype=jnp.bfloat16, lane=None):
    """Pad/cast the weights ONCE (hoisted out of the forward path).

    w*: (in, out) = transpose of PyTorch nn.Linear.weight; b*: (out,) or (1, out).
    """
    if lane is None:
        _, lane = _tpu_info()
    F, H = w1.shape
    assert w2.shape == (H, H), "w2 must be (H, H) with (in, out) layout"
    assert w3.shape[0] == H, "w3 must be (H, O) with (in, out) layout"
    O = w3.shape[1]

    Fp, Hp, Op = _round_up(F, lane), _round_up(H, lane), _round_up(O, lane)
    cd = jnp.dtype(compute_dtype)

    params = dict(
        w1=jnp.pad(jnp.asarray(w1, cd), ((0, Fp - F), (0, Hp - H))),
        b1=jnp.pad(jnp.asarray(b1, jnp.float32).reshape(1, -1), ((0, 0), (0, Hp - H))),
        w2=jnp.pad(jnp.asarray(w2, cd), ((0, Hp - H), (0, Hp - H))),
        b2=jnp.pad(jnp.asarray(b2, jnp.float32).reshape(1, -1), ((0, 0), (0, Hp - H))),
        w3=jnp.pad(jnp.asarray(w3, cd), ((0, Hp - H), (0, Op - O))),
        b3=jnp.pad(jnp.asarray(b3, jnp.float32).reshape(1, -1), ((0, 0), (0, Op - O))),
    )
    dims = dict(F=F, H=H, O=O, Fp=Fp, Hp=Hp, Op=Op, compute_dtype=cd)
    return params, dims


def jointnet_apply(params, dims, x, *, out_dtype=None, block_m=None,
                   single_buffer_weights=True):
    """Fused forward pass.  x: (M, F)."""
    M, F = x.shape
    assert F == dims["F"], f"x has {F} features, weights expect {dims['F']}"
    Fp, Hp, Op = dims["Fp"], dims["Hp"], dims["Op"]
    cd = dims["compute_dtype"]
    out_dtype = jnp.dtype(out_dtype) if out_dtype is not None else x.dtype
    out_bytes = out_dtype.itemsize
    SUB = 16 if cd == jnp.dtype(jnp.bfloat16) else 8

    # ---- generation-aware VMEM budget & batch-tile derivation -------------------
    vmem_cap, _ = _tpu_info()
    vmem_cap_limit = int(min(vmem_cap - 16 * _MIB, 100 * _MIB))   # headroom for Mosaic scratch

    w_bufs = 1 if single_buffer_weights else 2
    weight_bytes = w_bufs * (Fp * Hp + Hp * Hp + Hp * Op) * cd.itemsize
    bias_bytes = w_bufs * (2 * Hp + Op) * 4
    # Per batch-row footprint: double-buffered x and out tiles + f32 h1/h2 live values.
    per_row = 2 * Fp * cd.itemsize + 2 * Op * out_bytes + 2 * Hp * 4
    budget = vmem_cap_limit - weight_bytes - bias_bytes - 2 * _MIB
    assert budget >= per_row * SUB, (
        f"Padded JointNet weights ({weight_bytes / _MIB:.1f} MiB) do not fit the VMEM "
        f"budget ({vmem_cap_limit / _MIB:.0f} MiB); a K-tiled reduction path is required.")
    # TODO(synk): add a K/N-tiled reduction grid axis (f32 VMEM accumulator + pl.when
    # init/finalize) so very large hidden sizes don't need fully-resident weights.

    max_bm = 1024 if vmem_cap >= 96 * _MIB else 512
    if block_m is None:
        block_m = max_bm
    bm = min(_round_up(block_m, SUB),
             (budget // per_row // SUB) * SUB,
             _round_up(M, SUB))
    bm = max(bm, SUB)
    Mp = _round_up(M, bm)
    grid = (Mp // bm,)

    # ---- only pad the activations when actually needed ---------------------------
    xp = x.astype(cd)
    if (Mp - M) or (Fp - F):
        xp = jnp.pad(xp, ((0, Mp - M), (0, Fp - F)))

    # ---- cost estimate & VMEM limit ----------------------------------------------
    flops = 2 * Mp * (Fp * Hp + Hp * Hp + Hp * Op)
    bytes_accessed = (Mp * Fp * cd.itemsize
                      + (Fp * Hp + Hp * Hp + Hp * Op) * cd.itemsize
                      + (2 * Hp + Op) * 4
                      + Mp * Op * out_bytes)
    cost = pl.CostEstimate(flops=flops, transcendentals=0,
                           bytes_accessed=bytes_accessed)

    used_est = weight_bytes + bias_bytes + bm * per_row + 4 * _MIB
    vmem_limit = int(min(max(used_est, 16 * _MIB), vmem_cap_limit))

    # ---- BlockSpecs ---------------------------------------------------------------
    def resident(shape):
        # Constant index_map -> DMA'd once; single-buffer to halve the dominant VMEM term.
        if single_buffer_weights:
            try:
                return pl.BlockSpec(shape, lambda i: (0, 0),
                                    pipeline_mode=pl.Buffered(1))
            except (TypeError, AttributeError):
                pass
        return pl.BlockSpec(shape, lambda i: (0, 0))

    out_padded = pl.pallas_call(
        jointnet_kernel,
        out_shape=jax.ShapeDtypeStruct((Mp, Op), out_dtype),
        grid_spec=pltpu.PrefetchScalarGridSpec(
            num_scalar_prefetch=0,
            grid=grid,
            in_specs=[
                pl.BlockSpec((bm, Fp), lambda i: (i, 0)),   # x tile (pipelined)
                resident((Fp, Hp)),                          # w1
                resident((1, Hp)),                           # b1 (f32)
                resident((Hp, Hp)),                          # w2
                resident((1, Hp)),                           # b2 (f32)
                resident((Hp, Op)),                          # w3
                resident((1, Op)),                           # b3 (f32)
            ],
            out_specs=pl.BlockSpec((bm, Op), lambda i: (i, 0)),
        ),
        compiler_params=pltpu.CompilerParams(
            dimension_semantics=("parallel",),
            vmem_limit_bytes=vmem_limit,
        ),
        cost_estimate=cost,
    )(xp, params["w1"], params["b1"], params["w2"], params["b2"],
      params["w3"], params["b3"])

    if (Mp != M) or (Op != dims["O"]):
        out_padded = out_padded[:M, :dims["O"]]
    return out_padded


def reference_forward(x, w1, b1, w2, b2, w3, b3, compute_dtype=jnp.bfloat16):
    """Same math as the kernel (bf16 MXU operands, f32 accumulate / bias / ReLU)."""
    b1 = jnp.asarray(b1, jnp.float32).reshape(1, -1)
    b2 = jnp.asarray(b2, jnp.float32).reshape(1, -1)
    b3 = jnp.asarray(b3, jnp.float32).reshape(1, -1)
    h1 = jnp.dot(x.astype(compute_dtype), jnp.asarray(w1, compute_dtype),
                 preferred_element_type=jnp.float32)
    h1 = jnp.maximum(h1 + b1, 0.0)
    h2 = jnp.dot(h1.astype(compute_dtype), jnp.asarray(w2, compute_dtype),
                 preferred_element_type=jnp.float32)
    h2 = jnp.maximum(h2 + b2, 0.0)
    o = jnp.dot(h2.astype(compute_dtype), jnp.asarray(w3, compute_dtype),
                preferred_element_type=jnp.float32) + b3
    return o.astype(x.dtype)


if __name__ == "__main__":
    # Small shapes consistent with JointNet(n_features, n_hidden, n_output).
    batch, n_features, n_hidden, n_output = 8, 32, 32, 16

    key = jax.random.PRNGKey(0)
    kx, k1, k2, k3, kb1, kb2, kb3 = jax.random.split(key, 7)

    x = jax.random.normal(kx, (batch, n_features), dtype=jnp.float32)

    def uinit(k, shape, fan_in):
        bound = 1.0 / jnp.sqrt(fan_in)
        return jax.random.uniform(k, shape, jnp.float32, -bound, bound)

    # (in, out) layout = transpose of PyTorch nn.Linear.weight.
    w1 = uinit(k1, (n_features, n_hidden), n_features)
    b1 = uinit(kb1, (n_hidden,), n_features)
    w2 = uinit(k2, (n_hidden, n_hidden), n_hidden)
    b2 = uinit(kb2, (n_hidden,), n_hidden)
    w3 = uinit(k3, (n_hidden, n_output), n_hidden)
    b3 = uinit(kb3, (n_output,), n_hidden)

    # Weight pad/cast is hoisted: done once here, reused for every forward call.
    params, dims = prepare_jointnet_params(w1, b1, w2, b2, w3, b3)

    try:
        out = jax.block_until_ready(
            jointnet_apply(params, dims, x, single_buffer_weights=True))
    except Exception:
        # Fallback path if single-buffered (Buffered(1)) resident specs are rejected.
        out = jax.block_until_ready(
            jointnet_apply(params, dims, x, single_buffer_weights=False))

    ref = reference_forward(x, w1, b1, w2, b2, w3, b3)
    assert out.shape == (batch, n_output)
    assert jnp.allclose(out, ref, atol=1e-2, rtol=1e-2), "mismatch vs reference"

    print("KERNEL_OK")
</pallas_src>

<mosaic_0001>
module attributes {stable_mosaic.version = 11 : i64} {
  func.func @jointnet_kernel(%arg0: i32, %arg1: memref<16x256xbf16, #tpu.memory_space<vmem>>, %arg2: memref<256x256xbf16, #tpu.memory_space<vmem>>, %arg3: memref<1x256xf32, #tpu.memory_space<vmem>>, %arg4: memref<256x256xbf16, #tpu.memory_space<vmem>>, %arg5: memref<1x256xf32, #tpu.memory_space<vmem>>, %arg6: memref<256x256xbf16, #tpu.memory_space<vmem>>, %arg7: memref<1x256xf32, #tpu.memory_space<vmem>>, %arg8: memref<16x256xf32, #tpu.memory_space<vmem>>) attributes {dimension_semantics = [#tpu.dimension_semantics<parallel>], iteration_bounds = array<i64: 1>, scalar_prefetch = 0 : i64, scratch_operands = 0 : i64, tpu.core_type = #tpu.core_type<tc>, window_params = [{transform_indices = @transform_0, window_bounds = array<i64: 16, 256>}, {pipeline_mode = #tpu.pipeline_mode<synchronous>, transform_indices = @transform_1, window_bounds = array<i64: 256, 256>}, {pipeline_mode = #tpu.pipeline_mode<synchronous>, transform_indices = @transform_2, window_bounds = array<i64: 1, 256>}, {pipeline_mode = #tpu.pipeline_mode<synchronous>, transform_indices = @transform_3, window_bounds = array<i64: 256, 256>}, {pipeline_mode = #tpu.pipeline_mode<synchronous>, transform_indices = @transform_4, window_bounds = array<i64: 1, 256>}, {pipeline_mode = #tpu.pipeline_mode<synchronous>, transform_indices = @transform_5, window_bounds = array<i64: 256, 256>}, {pipeline_mode = #tpu.pipeline_mode<synchronous>, transform_indices = @transform_6, window_bounds = array<i64: 1, 256>}, {transform_indices = @transform_7, window_bounds = array<i64: 16, 256>}]} {
    %c0 = arith.constant 0 : index
    %c0_0 = arith.constant 0 : index
    %0 = vector.load %arg1[%c0, %c0_0] : memref<16x256xbf16, #tpu.memory_space<vmem>>, vector<16x256xbf16>
    %c0_1 = arith.constant 0 : index
    %c0_2 = arith.constant 0 : index
    %1 = vector.load %arg2[%c0_1, %c0_2] : memref<256x256xbf16, #tpu.memory_space<vmem>>, vector<256x256xbf16>
    %cst = arith.constant dense<0.000000e+00> : vector<16x256xf32>
    %2 = tpu.matmul %0, %1, %cst {dimension_numbers = #tpu.dot_dimension_numbers<[1], [0], [0], [1], [0, 0, 1, 1], [], []>} : vector<16x256xbf16>, vector<256x256xbf16>, vector<16x256xf32> -> vector<16x256xf32>
    %c0_3 = arith.constant 0 : index
    %c0_4 = arith.constant 0 : index
    %3 = vector.load %arg3[%c0_3, %c0_4] : memref<1x256xf32, #tpu.memory_space<vmem>>, vector<1x256xf32>
    %4 = vector.broadcast %3 : vector<1x256xf32> to vector<16x256xf32>
    %5 = arith.addf %2, %4 : vector<16x256xf32>
    %cst_5 = arith.constant 0.000000e+00 : f32
    %6 = vector.broadcast %cst_5 : f32 to vector<16x256xf32>
    %7 = arith.maximumf %5, %6 : vector<16x256xf32>
    %8 = arith.truncf %7 : vector<16x256xf32> to vector<16x256xbf16>
    %c0_6 = arith.constant 0 : index
    %c0_7 = arith.constant 0 : index
    %9 = vector.load %arg4[%c0_6, %c0_7] : memref<256x256xbf16, #tpu.memory_space<vmem>>, vector<256x256xbf16>
    %cst_8 = arith.constant dense<0.000000e+00> : vector<16x256xf32>
    %10 = tpu.matmul %8, %9, %cst_8 {dimension_numbers = #tpu.dot_dimension_numbers<[1], [0], [0], [1], [0, 0, 1, 1], [], []>} : vector<16x256xbf16>, vector<256x256xbf16>, vector<16x256xf32> -> vector<16x256xf32>
    %c0_9 = arith.constant 0 : index
    %c0_10 = arith.constant 0 : index
    %11 = vector.load %arg5[%c0_9, %c0_10] : memref<1x256xf32, #tpu.memory_space<vmem>>, vector<1x256xf32>
    %12 = vector.broadcast %11 : vector<1x256xf32> to vector<16x256xf32>
    %13 = arith.addf %10, %12 : vector<16x256xf32>
    %cst_11 = arith.constant 0.000000e+00 : f32
    %14 = vector.broadcast %cst_11 : f32 to vector<16x256xf32>
    %15 = arith.maximumf %13, %14 : vector<16x256xf32>
    %16 = arith.truncf %15 : vector<16x256xf32> to vector<16x256xbf16>
    %c0_12 = arith.constant 0 : index
    %c0_13 = arith.constant 0 : index
    %17 = vector.load %arg6[%c0_12, %c0_13] : memref<256x256xbf16, #tpu.memory_space<vmem>>, vector<256x256xbf16>
    %cst_14 = arith.constant dense<0.000000e+00> : vector<16x256xf32>
    %18 = tpu.matmul %16, %17, %cst_14 {dimension_numbers = #tpu.dot_dimension_numbers<[1], [0], [0], [1], [0, 0, 1, 1], [], []>} : vector<16x256xbf16>, vector<256x256xbf16>, vector<16x256xf32> -> vector<16x256xf32>
    %c0_15 = arith.constant 0 : index
    %c0_16 = arith.constant 0 : index
    %19 = vector.load %arg7[%c0_15, %c0_16] : memref<1x256xf32, #tpu.memory_space<vmem>>, vector<1x256xf32>
    %20 = vector.broadcast %19 : vector<1x256xf32> to vector<16x256xf32>
    %21 = arith.addf %18, %20 : vector<16x256xf32>
    %c0_17 = arith.constant 0 : index
    %c0_18 = arith.constant 0 : index
    %22 = vector.load %arg8[%c0_17, %c0_18] : memref<16x256xf32, #tpu.memory_space<vmem>>, vector<16x256xf32>
    tpu.vector_store %arg8[%c0_17, %c0_18], %21 {strides = array<i32>} : memref<16x256xf32, #tpu.memory_space<vmem>>, vector<16x256xf32>,
    return
  }
  func.func @transform_0(%arg0: i32) -> (i32, i32) {
    %c0_i32 = arith.constant 0 : i32
    %c0_i32_0 = arith.constant 0 : i32
    return %arg0, %c0_i32 : i32, i32
  }
  func.func @transform_1(%arg0: i32) -> (i32, i32) {
    %c0_i32 = arith.constant 0 : i32
    %c0_i32_0 = arith.constant 0 : i32
    %c0_i32_1 = arith.constant 0 : i32
    return %c0_i32, %c0_i32_0 : i32, i32
  }
  func.func @transform_2(%arg0: i32) -> (i32, i32) {
    %c0_i32 = arith.constant 0 : i32
    %c0_i32_0 = arith.constant 0 : i32
    %c0_i32_1 = arith.constant 0 : i32
    return %c0_i32, %c0_i32_0 : i32, i32
  }
  func.func @transform_3(%arg0: i32) -> (i32, i32) {
    %c0_i32 = arith.constant 0 : i32
    %c0_i32_0 = arith.constant 0 : i32
    %c0_i32_1 = arith.constant 0 : i32
    return %c0_i32, %c0_i32_0 : i32, i32
  }
  func.func @transform_4(%arg0: i32) -> (i32, i32) {
    %c0_i32 = arith.constant 0 : i32
    %c0_i32_0 = arith.constant 0 : i32
    %c0_i32_1 = arith.constant 0 : i32
    return %c0_i32, %c0_i32_0 : i32, i32
  }
  func.func @transform_5(%arg0: i32) -> (i32, i32) {
    %c0_i32 = arith.constant 0 : i32
    %c0_i32_0 = arith.constant 0 : i32
    %c0_i32_1 = arith.constant 0 : i32
    return %c0_i32, %c0_i32_0 : i32, i32
  }
  func.func @transform_6(%arg0: i32) -> (i32, i32) {
    %c0_i32 = arith.constant 0 : i32
    %c0_i32_0 = arith.constant 0 : i32
    %c0_i32_1 = arith.constant 0 : i32
    return %c0_i32, %c0_i32_0 : i32, i32
  }
  func.func @transform_7(%arg0: i32) -> (i32, i32) {
    %c0_i32 = arith.constant 0 : i32
    %c0_i32_0 = arith.constant 0 : i32
    return %arg0, %c0_i32 : i32, i32
  }
}

module attributes {stable_mosaic.version = 11 : i64} {
  func.func @jointnet_kernel(%arg0: i32, %arg1: memref<16x256xbf16, #tpu.memory_space<vmem>>, %arg2: memref<256x256xbf16, #tpu.memory_space<vmem>>, %arg3: memref<1x256xf32, #tpu.memory_space<vmem>>, %arg4: memref<256x256xbf16, #tpu.memory_space<vmem>>, %arg5: memref<1x256xf32, #tpu.memory_space<vmem>>, %arg6: memref<256x256xbf16, #tpu.memory_space<vmem>>, %arg7: memref<1x256xf32, #tpu.memory_space<vmem>>, %arg8: memref<16x256xf32, #tpu.memory_space<vmem>>) attributes {dimension_semantics = [#tpu.dimension_semantics<parallel>], iteration_bounds = array<i64: 1>, scalar_prefetch = 0 : i64, scratch_operands = 0 : i64, tpu.core_type = #tpu.core_type<tc>, window_params = [{transform_indices = @transform_0, window_bounds = array<i64: 16, 256>}, {pipeline_mode = #tpu.pipeline_mode<synchronous>, transform_indices = @transform_1, window_bounds = array<i64: 256, 256>}, {pipeline_mode = #tpu.pipeline_mode<synchronous>, transform_indices = @transform_2, window_bounds = array<i64: 1, 256>}, {pipeline_mode = #tpu.pipeline_mode<synchronous>, transform_indices = @transform_3, window_bounds = array<i64: 256, 256>}, {pipeline_mode = #tpu.pipeline_mode<synchronous>, transform_indices = @transform_4, window_bounds = array<i64: 1, 256>}, {pipeline_mode = #tpu.pipeline_mode<synchronous>, transform_indices = @transform_5, window_bounds = array<i64: 256, 256>}, {pipeline_mode = #tpu.pipeline_mode<synchronous>, transform_indices = @transform_6, window_bounds = array<i64: 1, 256>}, {transform_indices = @transform_7, window_bounds = array<i64: 16, 256>}]} {
    %c0 = arith.constant 0 : index
    %c0_0 = arith.constant 0 : index
    %0 = vector.load %arg1[%c0, %c0_0] : memref<16x256xbf16, #tpu.memory_space<vmem>>, vector<16x256xbf16>
    %c0_1 = arith.constant 0 : index
    %c0_2 = arith.constant 0 : index
    %1 = vector.load %arg2[%c0_1, %c0_2] : memref<256x256xbf16, #tpu.memory_space<vmem>>, vector<256x256xbf16>
    %cst = arith.constant dense<0.000000e+00> : vector<16x256xf32>
    %2 = tpu.matmul %0, %1, %cst {dimension_numbers = #tpu.dot_dimension_numbers<[1], [0], [0], [1], [0, 0, 1, 1], [], []>} : vector<16x256xbf16>, vector<256x256xbf16>, vector<16x256xf32> -> vector<16x256xf32>
    %c0_3 = arith.constant 0 : index
    %c0_4 = arith.constant 0 : index
    %3 = vector.load %arg3[%c0_3, %c0_4] : memref<1x256xf32, #tpu.memory_space<vmem>>, vector<1x256xf32>
    %4 = vector.broadcast %3 : vector<1x256xf32> to vector<16x256xf32>
    %5 = arith.addf %2, %4 : vector<16x256xf32>
    %cst_5 = arith.constant 0.000000e+00 : f32
    %6 = vector.broadcast %cst_5 : f32 to vector<16x256xf32>
    %7 = arith.maximumf %5, %6 : vector<16x256xf32>
    %8 = arith.truncf %7 : vector<16x256xf32> to vector<16x256xbf16>
    %c0_6 = arith.constant 0 : index
    %c0_7 = arith.constant 0 : index
    %9 = vector.load %arg4[%c0_6, %c0_7] : memref<256x256xbf16, #tpu.memory_space<vmem>>, vector<256x256xbf16>
    %cst_8 = arith.constant dense<0.000000e+00> : vector<16x256xf32>
    %10 = tpu.matmul %8, %9, %cst_8 {dimension_numbers = #tpu.dot_dimension_numbers<[1], [0], [0], [1], [0, 0, 1, 1], [], []>} : vector<16x256xbf16>, vector<256x256xbf16>, vector<16x256xf32> -> vector<16x256xf32>
    %c0_9 = arith.constant 0 : index
    %c0_10 = arith.constant 0 : index
    %11 = vector.load %arg5[%c0_9, %c0_10] : memref<1x256xf32, #tpu.memory_space<vmem>>, vector<1x256xf32>
    %12 = vector.broadcast %11 : vector<1x256xf32> to vector<16x256xf32>
    %13 = arith.addf %10, %12 : vector<16x256xf32>
    %cst_11 = arith.constant 0.000000e+00 : f32
    %14 = vector.broadcast %cst_11 : f32 to vector<16x256xf32>
    %15 = arith.maximumf %13, %14 : vector<16x256xf32>
    %16 = arith.truncf %15 : vector<16x256xf32> to vector<16x256xbf16>
    %c0_12 = arith.constant 0 : index
    %c0_13 = arith.constant 0 : index
    %17 = vector.load %arg6[%c0_12, %c0_13] : memref<256x256xbf16, #tpu.memory_space<vmem>>, vector<256x256xbf16>
    %cst_14 = arith.constant dense<0.000000e+00> : vector<16x256xf32>
    %18 = tpu.matmul %16, %17, %cst_14 {dimension_numbers = #tpu.dot_dimension_numbers<[1], [0], [0], [1], [0, 0, 1, 1], [], []>} : vector<16x256xbf16>, vector<256x256xbf16>, vector<16x256xf32> -> vector<16x256xf32>
    %c0_15 = arith.constant 0 : index
    %c0_16 = arith.constant 0 : index
    %19 = vector.load %arg7[%c0_15, %c0_16] : memref<1x256xf32, #tpu.memory_space<vmem>>, vector<1x256xf32>
    %20 = vector.broadcast %19 : vector<1x256xf32> to vector<16x256xf32>
    %21 = arith.addf %18, %20 : vector<16x256xf32>
    %c0_17 = arith.constant 0 : index
    %c0_18 = arith.constant 0 : index
    %22 = vector.load %arg8[%c0_17, %c0_18] : memref<16x256xf32, #tpu.memory_space<vmem>>, vector<16x256xf32>
    tpu.vector_store %arg8[%c0_17, %c0_18], %21 {strides = array<i32>} : memref<16x256xf32, #tpu.memory_space<vmem>>, vector<16x256xf32>,
    return
  }
  func.func @transform_0(%arg0: i32) -> (i32, i32) {
    %c0_i32 = arith.constant 0 : i32
    %c0_i32_0 = arith.constant 0 : i32
    return %arg0, %c0_i32 : i32, i32
  }
  func.func @transform_1(%arg0: i32) -> (i32, i32) {
    %c0_i32 = arith.constant 0 : i32
    %c0_i32_0 = arith.constant 0 : i32
    %c0_i32_1 = arith.constant 0 : i32
    return %c0_i32, %c0_i32_0 : i32, i32
  }
  func.func @transform_2(%arg0: i32) -> (i32, i32) {
    %c0_i32 = arith.constant 0 : i32
    %c0_i32_0 = arith.constant 0 : i32
    %c0_i32_1 = arith.constant 0 : i32
    return %c0_i32, %c0_i32_0 : i32, i32
  }
  func.func @transform_3(%arg0: i32) -> (i32, i32) {
    %c0_i32 = arith.constant 0 : i32
    %c0_i32_0 = arith.constant 0 : i32
    %c0_i32_1 = arith.constant 0 : i32
    return %c0_i32, %c0_i32_0 : i32, i32
  }
  func.func @transform_4(%arg0: i32) -> (i32, i32) {
    %c0_i32 = arith.constant 0 : i32
    %c0_i32_0 = arith.constant 0 : i32
    %c0_i32_1 = arith.constant 0 : i32
    return %c0_i32, %c0_i32_0 : i32, i32
  }
  func.func @transform_5(%arg0: i32) -> (i32, i32) {
    %c0_i32 = arith.constant 0 : i32
    %c0_i32_0 = arith.constant 0 : i32
    %c0_i32_1 = arith.constant 0 : i32
    return %c0_i32, %c0_i32_0 : i32, i32
  }
  func.func @transform_6(%arg0: i32) -> (i32, i32) {
    %c0_i32 = arith.constant 0 : i32
    %c0_i32_0 = arith.constant 0 : i32
    %c0_i32_1 = arith.constant 0 : i32
    return %c0_i32, %c0_i32_0 : i32, i32
  }
  func.func @transform_7(%arg0: i32) -> (i32, i32) {
    %c0_i32 = arith.constant 0 : i32
    %c0_i32_0 = arith.constant 0 : i32
    return %arg0, %c0_i32 : i32, i32
  }
}

</mosaic_0001>

<bundles_post_ra>
// kernel: tpu_custom_call.1
= control target key start
LH: loop header
LB: loop body
LE: loop exit
PB: predicated region body
PF: predicated region fallthrough
CT: control target
= control target key end

     0   :  { %12 = vsyncpa [#allocation3], 0  ;;  %s1317_s0 = inlined_call_operand.hbm [shape: bf16[16,256], index: 0, kind: input, shape index: {}]   ;;  %s1318_s1 = inlined_call_operand.hbm [shape: bf16[256,256], index: 1, kind: input, shape index: {}]   ;;  %s1319_s2 = inlined_call_operand.vmem [shape: f32[1,256], index: 2, kind: input, shape index: {}]   ;;  %s1320_s3 = inlined_call_operand.hbm [shape: bf16[256,256], index: 3, kind: input, shape index: {}]   ;;  %s1321_s4 = inlined_call_operand.vmem [shape: f32[1,256], index: 4, kind: input, shape index: {}]   ;;  %s1322_s5 = inlined_call_operand.hbm [shape: bf16[256,256], index: 5, kind: input, shape index: {}]   ;;  %s1323_s6 = inlined_call_operand.vmem [shape: f32[1,256], index: 6, kind: input, shape index: {}]   ;;  %s1324_s7 = inlined_call_operand.hbm [shape: f32[16,256], index: 7, kind: output, shape index: {}]  }
   0x1   :  { %13 = vsyncpa [#allocation6], 0 }
   0x2   :  { %14 = vsyncpa [#allocation9], 0 }
   0x3   :  { %15 = vsyncpa [#allocation4], 0  ;;  %s1232_s24 = smov [#allocation5]   ;;  %s1233_s26 = smov [#allocation2]  }
   0x4   :  { %s33_s25 = sshll.u32 %s1232_s24, 4  ;;  %s21_s27 = sshll.u32 %s1233_s26, 4  ;;  %s34_s25 = int_to_ptr.vmem [resolvable:$true] %s33_s25  ;;  %s22_s27 = int_to_ptr.vmem [resolvable:$true] %s21_s27 }
   0x5   :  { %s1132_s28 = scalar_lea.vmem %s34_s25, 4096  ;;  %p1137_p1 = scmp.lt.s32.totalorder %s34_s25, %s34_s25 }
   0x6   :  { %p1133_p0 = scmp.ne.s32.totalorder %s34_s25, %s1132_s28  ;;  %p1138_p2 = scmp.lt.s32.totalorder %s1132_s28, %s1132_s28 }
   0x8   :  { %p1139_p3 = por %p1138_p2, %p1137_p1 }
   0xa   :  { %p1140_p4 = pnand %p1139_p3, %p1133_p0 }
   0xc   :  { %1143 = shalt.err (!%p1140_p4)
}
   0xd   :  { %s1234_s29 = smov 128   ;;  %s1235_s30 = smov 8  }
   0xe   :  { %39 = dma.hbm_to_vmem [thread:$0]  %s1318_s1, 4096, %s34_s25, [#allocation6], %s1234_s29, %s1234_s29, %s1235_s30  }
   0xf   :  { %s1152_s10 = scalar_lea.vmem %s22_s27, 256  ;;  %p1157_p6 = scmp.lt.s32.totalorder %s22_s27, %s22_s27 }
  0x10   :  { %p1153_p5 = scmp.ne.s32.totalorder %s22_s27, %s1152_s10  ;;  %p1158_p7 = scmp.lt.s32.totalorder %s1152_s10, %s1152_s10 }
  0x12   :  { %p1159_p8 = por %p1158_p7, %p1157_p6 }
  0x14   :  { %p1160_p9 = pnand %p1159_p8, %p1153_p5 }
  0x16   :  { %1163 = shalt.err (!%p1160_p9)
}
  0x17   :  { %27 = dma.hbm_to_vmem [thread:$0]  %s1317_s0, 256, %s22_s27, [#allocation3], %s1234_s29, %s1234_s29, %s1235_s30  }
  0x18   :  { %s1236_s13 = smov [#allocation7]   ;;  %s1237_s15 = smov [#allocation8]  }
  0x19   :  { %s47_s14 = sshll.u32 %s1236_s13, 4  ;;  %s61_s16 = sshll.u32 %s1237_s15, 4  ;;  %s48_s14 = int_to_ptr.vmem [resolvable:$true] %s47_s14  ;;  %s62_s16 = int_to_ptr.vmem [resolvable:$true] %s61_s16 }
  0x1a   :  { %s1172_s1 = scalar_lea.vmem %s48_s14, 4096  ;;  %p1177_p11 = scmp.lt.s32.totalorder %s48_s14, %s48_s14 }
  0x1b   :  { %p1173_p10 = scmp.ne.s32.totalorder %s48_s14, %s1172_s1  ;;  %p1178_p12 = scmp.lt.s32.totalorder %s1172_s1, %s1172_s1 }
  0x1d   :  { %p1179_p13 = por %p1178_p12, %p1177_p11 }
  0x1f   :  { %p1180_p0 = pnand %p1179_p13, %p1173_p10 }
  0x21   :  { %1183 = shalt.err (!%p1180_p0)
}
  0x22   :  { %53 = dma.hbm_to_vmem [thread:$0]  %s1320_s3, 4096, %s48_s14, [#allocation6], %s1234_s29, %s1234_s29, %s1235_s30  }
  0x23   :  { %s1192_s0 = scalar_lea.vmem %s62_s16, 4096  ;;  %p1197_p2 = scmp.lt.s32.totalorder %s62_s16, %s62_s16 }
  0x24   :  { %p1193_p1 = scmp.ne.s32.totalorder %s62_s16, %s1192_s0  ;;  %p1198_p3 = scmp.lt.s32.totalorder %s1192_s0, %s1192_s0 }
  0x26   :  { %p1199_p4 = por %p1198_p3, %p1197_p2 }
  0x28   :  { %p1200_p5 = pnand %p1199_p4, %p1193_p1 }
  0x2a   :  { %1203 = shalt.err (!%p1200_p5)
}
  0x2b   :  { %67 = dma.hbm_to_vmem [thread:$0]  %s1322_s5, 4096, %s62_s16, [#allocation9], %s1234_s29, %s1234_s29, %s1235_s30  }
  0x2c   :  { %1224 = dma.done.wait [#allocation3], 256  }
  0x2d   :  { %1225 = vsyncadd [#allocation3], 4294967040 }
  0x2e   :  { %1226 = dma.done.wait [#allocation6], 8192  }
  0x2f   :  { %1227 = vsyncadd [#allocation6], 4294959104 }
  0x30   :  { %1228 = dma.done.wait [#allocation9], 4096  }
  0x31   :  { %1229 = vsyncadd [#allocation9], 4294963200  ;;  %v977_v0 = vld [vmem:[#allocation5 + $0x74] ss:$8 sps:$4 sm:$0xff]   ;;  %v979_v1 = vld [vmem:[#allocation5 + $0x70] ss:$8 sps:$4 sm:$0xff]  }
  0x32   :  { %298 = vmatprep.subr.bf16.mxu0 %v977_v0  ;;  %v980_v2 = vld [vmem:[#allocation5 + $0x64] ss:$8 sps:$4 sm:$0xff]   ;;  %v982_v3 = vld [vmem:[#allocation5 + $0x60] ss:$8 sps:$4 sm:$0xff]   ;;  %v983_v4 = vld [vmem:[#allocation5 + $0x54] ss:$8 sps:$4 sm:$0xff]  }
  0x33   :  { %299 = vmatpush1.bf16.msra.mxu0 %v979_v1  ;;  %v985_v5 = vld [vmem:[#allocation5 + $0x50] ss:$8 sps:$4 sm:$0xff]   ;;  %v986_v6 = vld [vmem:[#allocation5 + $0x44] ss:$8 sps:$4 sm:$0xff]   ;;  %v988_v7 = vld [vmem:[#allocation5 + $0x40] ss:$8 sps:$4 sm:$0xff]  }
  0x34   :  { %300 = vmatprep.subr.bf16.mxu0 %v980_v2  ;;  %v989_v8 = vld [vmem:[#allocation5 + $0x34] ss:$8 sps:$4 sm:$0xff]   ;;  %v991_v9 = vld [vmem:[#allocation5 + $0x30] ss:$8 sps:$4 sm:$0xff]   ;;  %v992_v10 = vld [vmem:[#allocation5 + $0x24] ss:$8 sps:$4 sm:$0xff]  }
  0x35   :  { %v994_v11 = vld [vmem:[#allocation5 + $0x20] ss:$8 sps:$4 sm:$0xff]   ;;  %v995_v12 = vld [vmem:[#allocation5 + $0x14] ss:$8 sps:$4 sm:$0xff]   ;;  %v997_v13 = vld [vmem:[#allocation5 + $0x10] ss:$8 sps:$4 sm:$0xff]  }
  0x36   :  { %v998_v14 = vld [vmem:[#allocation5 + $0x4] ss:$8 sps:$4 sm:$0xff]   ;;  %v1027_v15 = vld [vmem:[#allocation2 + $0x4] ss:$8 sps:$4 sm:$0xff]   ;;  %v1030_v17 = vld [vmem:[#allocation7 + $0x70] ss:$8 sps:$4 sm:$0xff]  }
  0x37   :  { %301 = vmatpush1.bf16.msra.mxu0 %v982_v3  ;;  %v1028_v16 = vld [vmem:[#allocation7 + $0x74] ss:$8 sps:$4 sm:$0xff]   ;;  %330 = vmatprep.mubr.bf16.mxu0 %v1027_v15  ;;  %v1031_v18 = vld [vmem:[#allocation7 + $0x64] ss:$8 sps:$4 sm:$0xff]   ;;  %v1033_v19 = vld [vmem:[#allocation7 + $0x60] ss:$8 sps:$4 sm:$0xff]  }
  0x38   :  { %302 = vmatprep.subr.bf16.mxu0 %v983_v4  ;;  %551 = vmatprep.subr.bf16.mxu1 %v1028_v16  ;;  %v1000_v20 = vld [vmem:[#allocation5] ss:$8 sps:$4 sm:$0xff]   ;;  %v1034_v21 = vld [vmem:[#allocation7 + $0x54] ss:$8 sps:$4 sm:$0xff]   ;;  %v1036_v23 = vld [vmem:[#allocation7 + $0x50] ss:$8 sps:$4 sm:$0xff]  }
  0x39   :  { %552 = vmatpush1.bf16.msra.mxu1 %v1030_v17  ;;  %v1001_v22 = vld [vmem:[#allocation5 + $0xf4] ss:$8 sps:$4 sm:$0xff]   ;;  %v1003_v24 = vld [vmem:[#allocation5 + $0xf0] ss:$8 sps:$4 sm:$0xff]   ;;  %v1037_v25 = vld [vmem:[#allocation7 + $0x44] ss:$8 sps:$4 sm:$0xff]  }
  0x3a   :  { %553 = vmatprep.subr.bf16.mxu1 %v1031_v18  ;;  %v1004_v26 = vld [vmem:[#allocation5 + $0xe4] ss:$8 sps:$4 sm:$0xff]   ;;  %v1039_v27 = vld [vmem:[#allocation7 + $0x40] ss:$8 sps:$4 sm:$0xff]   ;;  %v1040_v29 = vld [vmem:[#allocation7 + $0x34] ss:$8 sps:$4 sm:$0xff]  }
  0x3b   :  { %303 = vmatpush1.bf16.msra.mxu0 %v985_v5  ;;  %v1006_v28 = vld [vmem:[#allocation5 + $0xe0] ss:$8 sps:$4 sm:$0xff]   ;;  %v1007_v30 = vld [vmem:[#allocation5 + $0xd4] ss:$8 sps:$4 sm:$0xff]   ;;  %v1009_v31 = vld [vmem:[#allocation5 + $0xd0] ss:$8 sps:$4 sm:$0xff]  }
  0x3c   :  { %304 = vmatprep.subr.bf16.mxu0 %v986_v6  ;;  %v1042_v32 = vld [vmem:[#allocation7 + $0x30] ss:$8 sps:$4 sm:$0xff]   ;;  %v1010_v33 = vld [vmem:[#allocation5 + $0xc4] ss:$8 sps:$4 sm:$0xff]   ;;  %v1045_v35 = vld [vmem:[#allocation7 + $0x20] ss:$8 sps:$4 sm:$0xff]  }
  0x3d   :  { %554 = vmatpush1.bf16.msra.mxu1 %v1033_v19  ;;  %v1043_v34 = vld [vmem:[#allocation7 + $0x24] ss:$8 sps:$4 sm:$0xff]   ;;  %v1012_v36 = vld [vmem:[#allocation5 + $0xc0] ss:$8 sps:$4 sm:$0xff]   ;;  %v1046_v37 = vld [vmem:[#allocation7 + $0x14] ss:$8 sps:$4 sm:$0xff]  }
  0x3e   :  { %555 = vmatprep.subr.bf16.mxu1 %v1034_v21  ;;  %v1013_v38 = vld [vmem:[#allocation5 + $0xb4] ss:$8 sps:$4 sm:$0xff]   ;;  %v1048_v39 = vld [vmem:[#allocation7 + $0x10] ss:$8 sps:$4 sm:$0xff]   ;;  %v1049_v41 = vld [vmem:[#allocation7 + $0x4] ss:$8 sps:$4 sm:$0xff]  }
  0x3f   :  { %305 = vmatpush1.bf16.msra.mxu0 %v988_v7  ;;  %v1015_v40 = vld [vmem:[#allocation5 + $0xb0] ss:$8 sps:$4 sm:$0xff]   ;;  %v1016_v42 = vld [vmem:[#allocation5 + $0xa4] ss:$8 sps:$4 sm:$0xff]   ;;  %v1051_v43 = vld [vmem:[#allocation7] ss:$8 sps:$4 sm:$0xff]  }
  0x40   :  { %306 = vmatprep.subr.bf16.mxu0 %v989_v8  ;;  %v1018_v44 = vld [vmem:[#allocation5 + $0xa0] ss:$8 sps:$4 sm:$0xff]   ;;  %v1052_v45 = vld [vmem:[#allocation7 + $0xf4] ss:$8 sps:$4 sm:$0xff]   ;;  %v1054_v47 = vld [vmem:[#allocation7 + $0xf0] ss:$8 sps:$4 sm:$0xff]  }
  0x41   :  { %556 = vmatpush1.bf16.msra.mxu1 %v1036_v23  ;;  %v1019_v46 = vld [vmem:[#allocation5 + $0x94] ss:$8 sps:$4 sm:$0xff]   ;;  %v1021_v48 = vld [vmem:[#allocation5 + $0x90] ss:$8 sps:$4 sm:$0xff]   ;;  %v1055_v49 = vld [vmem:[#allocation7 + $0xe4] ss:$8 sps:$4 sm:$0xff]  }
  0x42   :  { %557 = vmatprep.subr.bf16.mxu1 %v1037_v25  ;;  %v1022_v50 = vld [vmem:[#allocation5 + $0x84] ss:$8 sps:$4 sm:$0xff]   ;;  %v1057_v51 = vld [vmem:[#allocation7 + $0xe0] ss:$8 sps:$4 sm:$0xff]   ;;  %v1058_v53 = vld [vmem:[#allocation7 + $0xd4] ss:$8 sps:$4 sm:$0xff]  }
  0x43   :  { %307 = vmatpush1.bf16.msra.mxu0 %v991_v9  ;;  %v1024_v52 = vld [vmem:[#allocation5 + $0x80] ss:$8 sps:$4 sm:$0xff]   ;;  %v1025_v54 = vld [vmem:[#allocation2] ss:$8 sps:$4 sm:$0xff]   ;;  %v1061_v56 = vld [vmem:[#allocation7 + $0xc4] ss:$8 sps:$4 sm:$0xff]  }
  0x44   :  { %308 = vmatprep.subr.bf16.mxu0 %v992_v10  ;;  %v1060_v55 = vld [vmem:[#allocation7 + $0xd0] ss:$8 sps:$4 sm:$0xff]   ;;  %v1063_v57 = vld [vmem:[#allocation7 + $0xc0] ss:$8 sps:$4 sm:$0xff]   ;;  %v1064_v58 = vld [vmem:[#allocation7 + $0xb4] ss:$8 sps:$4 sm:$0xff]  }
  0x45   :  { %558 = vmatpush1.bf16.msra.mxu1 %v1039_v27  ;;  %v1066_v59 = vld [vmem:[#allocation7 + $0xb0] ss:$8 sps:$4 sm:$0xff]   ;;  %v1067_v60 = vld [vmem:[#allocation7 + $0xa4] ss:$8 sps:$4 sm:$0xff]   ;;  %v1069_v61 = vld [vmem:[#allocation7 + $0xa0] ss:$8 sps:$4 sm:$0xff]  }
  0x46   :  { %559 = vmatprep.subr.bf16.mxu1 %v1040_v29  ;;  %v1070_v62 = vld [vmem:[#allocation7 + $0x94] ss:$8 sps:$4 sm:$0xff]   ;;  %v1072_v63 = vld [vmem:[#allocation7 + $0x90] ss:$8 sps:$4 sm:$0xff]   ;;  %v1073_v0 = vld [vmem:[#allocation7 + $0x84] ss:$8 sps:$4 sm:$0xff]  }
  0x47   :  { %309 = vmatpush1.bf16.msra.mxu0 %v994_v11  ;;  %v1075_v1 = vld [vmem:[#allocation7 + $0x80] ss:$8 sps:$4 sm:$0xff]   ;;  %v1076_v2 = vld [vmem:[#allocation8 + $0x70] ss:$8 sps:$4 sm:$0xff]   ;;  %v1078_v3 = vld [vmem:[#allocation8 + $0x74] ss:$8 sps:$4 sm:$0xff]  }
  0x48   :  { %310 = vmatprep.subr.bf16.mxu0 %v995_v12  ;;  %v1081_v4 = vld [vmem:[#allocation8 + $0x64] ss:$8 sps:$4 sm:$0xff]   ;;  %v1079_v5 = vld [vmem:[#allocation8 + $0x60] ss:$8 sps:$4 sm:$0xff]   ;;  %v1084_v6 = vld [vmem:[#allocation8 + $0x54] ss:$8 sps:$4 sm:$0xff]  }
  0x49   :  { %560 = vmatpush1.bf16.msra.mxu1 %v1042_v32  ;;  %v1082_v7 = vld [vmem:[#allocation8 + $0x50] ss:$8 sps:$4 sm:$0xff]   ;;  %v1087_v8 = vld [vmem:[#allocation8 + $0x44] ss:$8 sps:$4 sm:$0xff]   ;;  %v1085_v9 = vld [vmem:[#allocation8 + $0x40] ss:$8 sps:$4 sm:$0xff]  }
  0x4a   :  { %561 = vmatprep.subr.bf16.mxu1 %v1043_v34  ;;  %v1090_v10 = vld [vmem:[#allocation8 + $0x34] ss:$8 sps:$4 sm:$0xff]   ;;  %v1088_v11 = vld [vmem:[#allocation8 + $0x30] ss:$8 sps:$4 sm:$0xff]   ;;  %v1093_v12 = vld [vmem:[#allocation8 + $0x24] ss:$8 sps:$4 sm:$0xff]  }
  0x4b   :  { %311 = vmatpush1.bf16.msra.mxu0 %v997_v13  ;;  %v1091_v13 = vld [vmem:[#allocation8 + $0x20] ss:$8 sps:$4 sm:$0xff]   ;;  %v1094_v15 = vld [vmem:[#allocation8 + $0x10] ss:$8 sps:$4 sm:$0xff]   ;;  %v1099_v16 = vld [vmem:[#allocation8 + $0x4] ss:$8 sps:$4 sm:$0xff]  }
  0x4c   :  { %312 = vmatprep.subr.bf16.mxu0 %v998_v14  ;;  %v1096_v14 = vld [vmem:[#allocation8 + $0x14] ss:$8 sps:$4 sm:$0xff]   ;;  %v1097_v17 = vld [vmem:[#allocation8] ss:$8 sps:$4 sm:$0xff]   ;;  %v1100_v19 = vld [vmem:[#allocation8 + $0xf0] ss:$8 sps:$4 sm:$0xff]  }
  0x4d   :  { %562 = vmatpush1.bf16.msra.mxu1 %v1045_v35  ;;  %v1102_v18 = vld [vmem:[#allocation8 + $0xf4] ss:$8 sps:$4 sm:$0xff]   ;;  %v1103_v21 = vld [vmem:[#allocation8 + $0xe0] ss:$8 sps:$4 sm:$0xff]   ;;  %v1106_v23 = vld [vmem:[#allocation8 + $0xd0] ss:$8 sps:$4 sm:$0xff]  }
  0x4e   :  { %563 = vmatprep.subr.bf16.mxu1 %v1046_v37  ;;  %v1109_v25 = vld [vmem:[#allocation8 + $0xc0] ss:$8 sps:$4 sm:$0xff]   ;;  %v1112_v27 = vld [vmem:[#allocation8 + $0xb0] ss:$8 sps:$4 sm:$0xff]   ;;  %s1238_s23 = smov [#allocation10]  }
  0x4f   :  { %313 = vmatpush1.bf16.msra.mxu0 %v1000_v20  ;;  %v1105_v20 = vld [vmem:[#allocation8 + $0xe4] ss:$8 sps:$4 sm:$0xff]   ;;  %v116_v32 = vld [vmem:[%s1319_s2] sm:$0x3]  ;;  %s856_s24 = sshll.u32 %s1238_s23, 4  ;;  %s857_s24 = int_to_ptr.vmem [resolvable:$true] %s856_s24 }
  0x50   :  { %314 = vmatprep.subr.bf16.mxu0 %v1001_v22  ;;  %v1108_v22 = vld [vmem:[#allocation8 + $0xd4] ss:$8 sps:$4 sm:$0xff]   ;;  %s1204_s25 = scalar_lea.vmem %s857_s24, 512  ;;  %p1209_p7 = scmp.lt.s32.totalorder %s857_s24, %s857_s24 }
  0x51   :  { %564 = vmatpush1.bf16.msra.mxu1 %v1048_v39  ;;  %p1205_p6 = scmp.ne.s32.totalorder %s857_s24, %s1204_s25  ;;  %p1210_p8 = scmp.lt.s32.totalorder %s1204_s25, %s1204_s25 }
  0x52   :  { %565 = vmatprep.subr.bf16.mxu1 %v1049_v41 }
  0x53   :  { %315 = vmatpush2.bf16.msra.mxu0 %v1003_v24  ;;  %v1111_v24 = vld [vmem:[#allocation8 + $0xc4] ss:$8 sps:$4 sm:$0xff]   ;;  %p1211_p9 = por %p1210_p8, %p1209_p7 }
  0x54   :  { %316 = vmatprep.subr.bf16.mxu0 %v1004_v26  ;;  %v1114_v26 = vld [vmem:[#allocation8 + $0xb4] ss:$8 sps:$4 sm:$0xff]  }
  0x55   :  { %566 = vmatpush1.bf16.msra.mxu1 %v1051_v43  ;;  %p1212_p10 = pnand %p1211_p9, %p1205_p6 }
  0x56   :  { %567 = vmatprep.subr.bf16.mxu1 %v1052_v45 }
  0x57   :  { %317 = vmatpush2.bf16.msra.mxu0 %v1006_v28  ;;  %v118_v28 = vlaneseq }
  0x58   :  { %318 = vmatprep.subr.bf16.mxu0 %v1007_v30 }
  0x59   :  { %568 = vmatpush2.bf16.msra.mxu1 %v1054_v47  ;;  %v119_v29 = vshrl.u32 %v118_v28, 7 }
  0x5a   :  { %569 = vmatprep.subr.bf16.mxu1 %v1055_v49  ;;  %v1117_v49 = vld [vmem:[#allocation8 + $0xa4] ss:$8 sps:$4 sm:$0xff]  }
  0x5b   :  { %319 = vmatpush2.bf16.msra.mxu0 %v1009_v31  ;;  %v124_v30 = vsub.s32 1, %v119_v29  ;;  %v120_v31 = vsub.s32 0, %v119_v29 }
  0x5c   :  { %320 = vmatprep.subr.bf16.mxu0 %v1010_v33 }
  0x5d   :  { %570 = vmatpush2.bf16.msra.mxu1 %v1057_v51  ;;  %v125_v34 = vrot.slane %v116_v32, %v124_v30  ;;  %v121_v35 = vrot.slane %v116_v32, %v120_v31  ;;  %v1120_v51 = vld [vmem:[#allocation8 + $0x94] ss:$8 sps:$4 sm:$0xff]  }
  0x5e   :  { %571 = vmatprep.subr.bf16.mxu1 %v1058_v53  ;;  %v1123_v53 = vld [vmem:[#allocation8 + $0x84] ss:$8 sps:$4 sm:$0xff]  }
  0x5f   :  { %321 = vmatpush2.bf16.msra.mxu0 %v1012_v36 }
  0x60   :  { %322 = vmatprep.subr.bf16.mxu0 %v1013_v38 }
  0x61   :  { %572 = vmatpush2.bf16.msra.mxu1 %v1060_v55  ;;  %v379_v55 = vld [vmem:[%s1321_s4] sm:$0x3] }
  0x62   :  { %573 = vmatprep.subr.bf16.mxu1 %v1061_v56 }
  0x63   :  { %323 = vmatpush2.bf16.msra.mxu0 %v1015_v40 }
  0x64   :  { %324 = vmatprep.subr.bf16.mxu0 %v1016_v42 }
  0x65   :  { %574 = vmatpush2.bf16.msra.mxu1 %v1063_v57  ;;  %v388_v57 = vrot.slane %v379_v55, %v124_v30 }
  0x66   :  { %575 = vmatprep.subr.bf16.mxu1 %v1064_v58  ;;  %v384_v58 = vrot.slane %v379_v55, %v120_v31 }
  0x67   :  { %325 = vmatpush2.bf16.msra.mxu0 %v1018_v44 }
  0x68   :  { %326 = vmatprep.subr.bf16.mxu0 %v1019_v46 }
  0x69   :  { %576 = vmatpush2.bf16.msra.mxu1 %v1066_v59 }
  0x6a   :  { %577 = vmatprep.subr.bf16.mxu1 %v1067_v60 }
  0x6b   :  { %327 = vmatpush2.bf16.msra.mxu0 %v1021_v48 }
  0x6c   :  { %328 = vmatprep.subr.bf16.mxu0 %v1022_v50  ;;  %v1115_v50 = vld [vmem:[#allocation8 + $0xa0] ss:$8 sps:$4 sm:$0xff]  }
  0x6d   :  { %578 = vmatpush2.bf16.msra.mxu1 %v1069_v61 }
  0x6e   :  { %579 = vmatprep.subr.bf16.mxu1 %v1070_v62 }
  0x6f   :  { %329 = vmatpush2.bf16.msra.mxu0 %v1024_v52  ;;  %v1118_v52 = vld [vmem:[#allocation8 + $0x90] ss:$8 sps:$4 sm:$0xff]  }
  0x70   :  { %804 = vmatprep.subr.bf16.mxu0 %v1078_v3 }
  0x71   :  { %580 = vmatpush2.bf16.msra.mxu1 %v1072_v63 }
  0x72   :  { %331 = vmatmul.mubr.bf16.vlgmr.msra.gmra.mxu0 %v1025_v54  ;;  %581 = vmatprep.subr.bf16.mxu1 %v1073_v0  ;;  %v1121_v54 = vld [vmem:[#allocation8 + $0x80] ss:$8 sps:$4 sm:$0xff]  }
  0x73   :  { %805 = vmatpush1.bf16.msra.mxu0 %v1076_v2 }
  0x74   :  { %806 = vmatprep.subr.bf16.mxu0 %v1081_v4 }
  0x75   :  { %582 = vmatpush2.bf16.msra.mxu1 %v1075_v1 }
  0x77   :  { %807 = vmatpush1.bf16.msra.mxu0 %v1079_v5 }
  0x78   :  { %808 = vmatprep.subr.bf16.mxu0 %v1084_v6 }
  0x7b   :  { %809 = vmatpush1.bf16.msra.mxu0 %v1082_v7 }
  0x7c   :  { %810 = vmatprep.subr.bf16.mxu0 %v1087_v8  ;;  %v632_v8 = vld [vmem:[%s1323_s6] sm:$0x3] }
  0x7f   :  { %811 = vmatpush1.bf16.msra.mxu0 %v1085_v9  ;;  %v637_v9 = vrot.slane %v632_v8, %v120_v31 }
  0x80   :  { %812 = vmatprep.subr.bf16.mxu0 %v1090_v10  ;;  %v641_v10 = vrot.slane %v632_v8, %v124_v30 }
  0x83   :  { %813 = vmatpush1.bf16.msra.mxu0 %v1088_v11 }
  0x84   :  { %814 = vmatprep.subr.bf16.mxu0 %v1093_v12 }
  0x87   :  { %815 = vmatpush1.bf16.msra.mxu0 %v1091_v13 }
  0x88   :  { %816 = vmatprep.subr.bf16.mxu0 %v1096_v14 }
  0x8b   :  { %817 = vmatpush1.bf16.msra.mxu0 %v1094_v15 }
  0x8c   :  { %818 = vmatprep.subr.bf16.mxu0 %v1099_v16 }
  0x8f   :  { %819 = vmatpush1.bf16.msra.mxu0 %v1097_v17 }
  0x90   :  { %820 = vmatprep.subr.bf16.mxu0 %v1102_v18 }
  0x93   :  { %821 = vmatpush2.bf16.msra.mxu0 %v1100_v19 }
  0x94   :  { %822 = vmatprep.subr.bf16.mxu0 %v1105_v20 }
  0x97   :  { %823 = vmatpush2.bf16.msra.mxu0 %v1103_v21 }
  0x98   :  { %824 = vmatprep.subr.bf16.mxu0 %v1108_v22 }
  0x9b   :  { %825 = vmatpush2.bf16.msra.mxu0 %v1106_v23 }
  0x9c   :  { %826 = vmatprep.subr.bf16.mxu0 %v1111_v24 }
  0x9f   :  { %827 = vmatpush2.bf16.msra.mxu0 %v1109_v25 }
  0xa0   :  { %828 = vmatprep.subr.bf16.mxu0 %v1114_v26 }
  0xa3   :  { %829 = vmatpush2.bf16.msra.mxu0 %v1112_v27 }
  0xa4   :  { %830 = vmatprep.subr.bf16.mxu0 %v1117_v49 }
  0xa7   :  { %831 = vmatpush2.bf16.msra.mxu0 %v1115_v50 }
  0xa8   :  { %832 = vmatprep.subr.bf16.mxu0 %v1120_v51 }
  0xab   :  { %833 = vmatpush2.bf16.msra.mxu0 %v1118_v52 }
  0xac   :  { %834 = vmatprep.subr.bf16.mxu0 %v1123_v53 }
  0xaf   :  { %835 = vmatpush2.bf16.msra.mxu0 %v1121_v54 }
 0x132   :  { %v332_v33 = vpop.f32.mrf.mxu0 }
 0x133   :  { %v333_v40 = vadd.f32 %v332_v33, %v121_v35 }
 0x134   :  { %v334_v36 = vpop.f32.mrf.mxu0 }
 0x135   :  { %v335_v38 = vadd.f32 %v334_v36, %v125_v34  ;;  %v341_v46 = vmax.f32 %v333_v40, 0.0 }
 0x136   :  { %v336_v37 = vpop.f32.mrf.mxu0 }
 0x137   :  { %v337_v39 = vadd.f32 %v336_v37, %v121_v35  ;;  %v342_v44 = vmax.f32 %v335_v38, 0.0 }
 0x138   :  { %v338_v41 = vpop.f32.mrf.mxu0 }
 0x139   :  { %v339_v42 = vadd.f32 %v338_v41, %v125_v34  ;;  %v343_v43 = vmax.f32 %v337_v39, 0.0 }
 0x13b   :  { %v344_v45 = vmax.f32 %v339_v42, 0.0  ;;  %v345_v48 = vpack.c.bf16 %v343_v43, %v341_v46 }
 0x13d   :  { %v346_v47 = vpack.c.bf16 %v344_v45, %v342_v44 }
 0x13f   :  { %583 = vmatprep.mubr.bf16.mxu1 %v346_v47 }
 0x140   :  { %584 = vmatmul.mubr.bf16.vlgmr.msra.gmra.mxu1 %v345_v48 }
 0x200   :  { %v585_v56 = vpop.f32.mrf.mxu1 }
 0x201   :  { %v586_v63 = vadd.f32 %v585_v56, %v384_v58 }
 0x202   :  { %v587_v59 = vpop.f32.mrf.mxu1 }
 0x203   :  { %v588_v61 = vadd.f32 %v587_v59, %v388_v57  ;;  %v594_v5 = vmax.f32 %v586_v63, 0.0 }
 0x204   :  { %v589_v60 = vpop.f32.mrf.mxu1 }
 0x205   :  { %v590_v62 = vadd.f32 %v589_v60, %v384_v58  ;;  %v595_v3 = vmax.f32 %v588_v61, 0.0 }
 0x206   :  { %v591_v0 = vpop.f32.mrf.mxu1 }
 0x207   :  { %v592_v1 = vadd.f32 %v591_v0, %v388_v57  ;;  %v596_v2 = vmax.f32 %v590_v62, 0.0 }
 0x209   :  { %v597_v4 = vmax.f32 %v592_v1, 0.0  ;;  %v598_v7 = vpack.c.bf16 %v596_v2, %v594_v5 }
 0x20b   :  { %v599_v6 = vpack.c.bf16 %v597_v4, %v595_v3 }
 0x20d   :  { %836 = vmatprep.mubr.bf16.mxu0 %v599_v6 }
 0x20e   :  { %837 = vmatmul.mubr.bf16.vlgmr.msra.gmra.mxu0 %v598_v7 }
 0x2ce   :  { %v838_v11 = vpop.f32.mrf.mxu0 }
 0x2cf   :  { %v839_v12 = vadd.f32 %v838_v11, %v637_v9 }
 0x2d0   :  { %v840_v13 = vpop.f32.mrf.mxu0 }
 0x2d1   :  { %847 = vst [vmem:[#allocation10] sm:$0xff] %v839_v12  ;;  %v841_v14 = vadd.f32 %v840_v13, %v641_v10 }
 0x2d2   :  { %v842_v15 = vpop.f32.mrf.mxu0 }
 0x2d3   :  { %848 = vst [vmem:[#allocation10 + $0x8] sm:$0xff] %v841_v14  ;;  %v843_v16 = vadd.f32 %v842_v15, %v637_v9 }
 0x2d4   :  { %v844_v17 = vpop.f32.mrf.mxu0 }
 0x2d5   :  { %849 = vst [vmem:[#allocation10 + $0x10] sm:$0xff] %v843_v16  ;;  %v845_v18 = vadd.f32 %v844_v17, %v641_v10 }
 0x2d7   :  { %850 = vst [vmem:[#allocation10 + $0x18] sm:$0xff] %v845_v18 }
 0x2d8   :  { %1215 = shalt.err (!%p1212_p10)
}
 0x2d9   :  { %s1239_s6 = smov 256   ;;  %s1240_s26 = smov 16  }
 0x2da   :  { %862 = dma.vmem_to_hbm [thread:$0]  %s857_s24, 512, %s1324_s7, [#allocation4], %s1239_s6, %s1239_s6, %s1240_s26  }
 0x2db   :  { %1230 = dma.done.wait [#allocation4], 512  }
 0x2dc   :  { %1231 = vsyncadd [#allocation4], 4294966784 }
 0x2dd   :  { %866 = vsyncpa [#allocation3], 1 }
 0x2de   :  { %867 = vsyncpa [#allocation6], 1 }
 0x2df   :  { %868 = vsyncpa [#allocation9], 1 }
 0x2e0   :  { %869 = vsyncpa [#allocation4], 1 }

// kernel: tpu_custom_call.1
= control target key start
LH: loop header
LB: loop body
LE: loop exit
PB: predicated region body
PF: predicated region fallthrough
CT: control target
= control target key end

     0   :  { %12 = vsyncpa [#allocation3], 0  ;;  %s1317_s0 = inlined_call_operand.hbm [shape: bf16[16,256], index: 0, kind: input, shape index: {}]   ;;  %s1318_s1 = inlined_call_operand.hbm [shape: bf16[256,256], index: 1, kind: input, shape index: {}]   ;;  %s1319_s2 = inlined_call_operand.vmem [shape: f32[1,256], index: 2, kind: input, shape index: {}]   ;;  %s1320_s3 = inlined_call_operand.hbm [shape: bf16[256,256], index: 3, kind: input, shape index: {}]   ;;  %s1321_s4 = inlined_call_operand.vmem [shape: f32[1,256], index: 4, kind: input, shape index: {}]   ;;  %s1322_s5 = inlined_call_operand.hbm [shape: bf16[256,256], index: 5, kind: input, shape index: {}]   ;;  %s1323_s6 = inlined_call_operand.vmem [shape: f32[1,256], index: 6, kind: input, shape index: {}]   ;;  %s1324_s7 = inlined_call_operand.hbm [shape: f32[16,256], index: 7, kind: output, shape index: {}]  }
   0x1   :  { %13 = vsyncpa [#allocation6], 0 }
   0x2   :  { %14 = vsyncpa [#allocation9], 0 }
   0x3   :  { %15 = vsyncpa [#allocation4], 0  ;;  %s1232_s24 = smov [#allocation5]   ;;  %s1233_s26 = smov [#allocation2]  }
   0x4   :  { %s33_s25 = sshll.u32 %s1232_s24, 4  ;;  %s21_s27 = sshll.u32 %s1233_s26, 4  ;;  %s34_s25 = int_to_ptr.vmem [resolvable:$true] %s33_s25  ;;  %s22_s27 = int_to_ptr.vmem [resolvable:$true] %s21_s27 }
   0x5   :  { %s1132_s28 = scalar_lea.vmem %s34_s25, 4096  ;;  %p1137_p1 = scmp.lt.s32.totalorder %s34_s25, %s34_s25 }
   0x6   :  { %p1133_p0 = scmp.ne.s32.totalorder %s34_s25, %s1132_s28  ;;  %p1138_p2 = scmp.lt.s32.totalorder %s1132_s28, %s1132_s28 }
   0x8   :  { %p1139_p3 = por %p1138_p2, %p1137_p1 }
   0xa   :  { %p1140_p4 = pnand %p1139_p3, %p1133_p0 }
   0xc   :  { %1143 = shalt.err (!%p1140_p4)
}
   0xd   :  { %s1234_s29 = smov 128   ;;  %s1235_s30 = smov 8  }
   0xe   :  { %39 = dma.hbm_to_vmem [thread:$0]  %s1318_s1, 4096, %s34_s25, [#allocation6], %s1234_s29, %s1234_s29, %s1235_s30  }
   0xf   :  { %s1152_s10 = scalar_lea.vmem %s22_s27, 256  ;;  %p1157_p6 = scmp.lt.s32.totalorder %s22_s27, %s22_s27 }
  0x10   :  { %p1153_p5 = scmp.ne.s32.totalorder %s22_s27, %s1152_s10  ;;  %p1158_p7 = scmp.lt.s32.totalorder %s1152_s10, %s1152_s10 }
  0x12   :  { %p1159_p8 = por %p1158_p7, %p1157_p6 }
  0x14   :  { %p1160_p9 = pnand %p1159_p8, %p1153_p5 }
  0x16   :  { %1163 = shalt.err (!%p1160_p9)
}
  0x17   :  { %27 = dma.hbm_to_vmem [thread:$0]  %s1317_s0, 256, %s22_s27, [#allocation3], %s1234_s29, %s1234_s29, %s1235_s30  }
  0x18   :  { %s1236_s13 = smov [#allocation7]   ;;  %s1237_s15 = smov [#allocation8]  }
  0x19   :  { %s47_s14 = sshll.u32 %s1236_s13, 4  ;;  %s61_s16 = sshll.u32 %s1237_s15, 4  ;;  %s48_s14 = int_to_ptr.vmem [resolvable:$true] %s47_s14  ;;  %s62_s16 = int_to_ptr.vmem [resolvable:$true] %s61_s16 }
  0x1a   :  { %s1172_s1 = scalar_lea.vmem %s48_s14, 4096  ;;  %p1177_p11 = scmp.lt.s32.totalorder %s48_s14, %s48_s14 }
  0x1b   :  { %p1173_p10 = scmp.ne.s32.totalorder %s48_s14, %s1172_s1  ;;  %p1178_p12 = scmp.lt.s32.totalorder %s1172_s1, %s1172_s1 }
  0x1d   :  { %p1179_p13 = por %p1178_p12, %p1177_p11 }
  0x1f   :  { %p1180_p0 = pnand %p1179_p13, %p1173_p10 }
  0x21   :  { %1183 = shalt.err (!%p1180_p0)
}
  0x22   :  { %53 = dma.hbm_to_vmem [thread:$0]  %s1320_s3, 4096, %s48_s14, [#allocation6], %s1234_s29, %s1234_s29, %s1235_s30  }
  0x23   :  { %s1192_s0 = scalar_lea.vmem %s62_s16, 4096  ;;  %p1197_p2 = scmp.lt.s32.totalorder %s62_s16, %s62_s16 }
  0x24   :  { %p1193_p1 = scmp.ne.s32.totalorder %s62_s16, %s1192_s0  ;;  %p1198_p3 = scmp.lt.s32.totalorder %s1192_s0, %s1192_s0 }
  0x26   :  { %p1199_p4 = por %p1198_p3, %p1197_p2 }
  0x28   :  { %p1200_p5 = pnand %p1199_p4, %p1193_p1 }
  0x2a   :  { %1203 = shalt.err (!%p1200_p5)
}
  0x2b   :  { %67 = dma.hbm_to_vmem [thread:$0]  %s1322_s5, 4096, %s62_s16, [#allocation9], %s1234_s29, %s1234_s29, %s1235_s30  }
  0x2c   :  { %1224 = dma.done.wait [#allocation3], 256  }
  0x2d   :  { %1225 = vsyncadd [#allocation3], 4294967040 }
  0x2e   :  { %1226 = dma.done.wait [#allocation6], 8192  }
  0x2f   :  { %1227 = vsyncadd [#allocation6], 4294959104 }
  0x30   :  { %1228 = dma.done.wait [#allocation9], 4096  }
  0x31   :  { %1229 = vsyncadd [#allocation9], 4294963200  ;;  %v977_v0 = vld [vmem:[#allocation5 + $0x74] ss:$8 sps:$4 sm:$0xff]   ;;  %v979_v1 = vld [vmem:[#allocation5 + $0x70] ss:$8 sps:$4 sm:$0xff]  }
  0x32   :  { %298 = vmatprep.subr.bf16.mxu0 %v977_v0  ;;  %v980_v2 = vld [vmem:[#allocation5 + $0x64] ss:$8 sps:$4 sm:$0xff]   ;;  %v982_v3 = vld [vmem:[#allocation5 + $0x60] ss:$8 sps:$4 sm:$0xff]   ;;  %v983_v4 = vld [vmem:[#allocation5 + $0x54] ss:$8 sps:$4 sm:$0xff]  }
  0x33   :  { %299 = vmatpush1.bf16.msra.mxu0 %v979_v1  ;;  %v985_v5 = vld [vmem:[#allocation5 + $0x50] ss:$8 sps:$4 sm:$0xff]   ;;  %v986_v6 = vld [vmem:[#allocation5 + $0x44] ss:$8 sps:$4 sm:$0xff]   ;;  %v988_v7 = vld [vmem:[#allocation5 + $0x40] ss:$8 sps:$4 sm:$0xff]  }
  0x34   :  { %300 = vmatprep.subr.bf16.mxu0 %v980_v2  ;;  %v989_v8 = vld [vmem:[#allocation5 + $0x34] ss:$8 sps:$4 sm:$0xff]   ;;  %v991_v9 = vld [vmem:[#allocation5 + $0x30] ss:$8 sps:$4 sm:$0xff]   ;;  %v992_v10 = vld [vmem:[#allocation5 + $0x24] ss:$8 sps:$4 sm:$0xff]  }
  0x35   :  { %v994_v11 = vld [vmem:[#allocation5 + $0x20] ss:$8 sps:$4 sm:$0xff]   ;;  %v995_v12 = vld [vmem:[#allocation5 + $0x14] ss:$8 sps:$4 sm:$0xff]   ;;  %v997_v13 = vld [vmem:[#allocation5 + $0x10] ss:$8 sps:$4 sm:$0xff]  }
  0x36   :  { %v998_v14 = vld [vmem:[#allocation5 + $0x4] ss:$8 sps:$4 sm:$0xff]   ;;  %v1027_v15 = vld [vmem:[#allocation2 + $0x4] ss:$8 sps:$4 sm:$0xff]   ;;  %v1030_v17 = vld [vmem:[#allocation7 + $0x70] ss:$8 sps:$4 sm:$0xff]  }
  0x37   :  { %301 = vmatpush1.bf16.msra.mxu0 %v982_v3  ;;  %v1028_v16 = vld [vmem:[#allocation7 + $0x74] ss:$8 sps:$4 sm:$0xff]   ;;  %330 = vmatprep.mubr.bf16.mxu0 %v1027_v15  ;;  %v1031_v18 = vld [vmem:[#allocation7 + $0x64] ss:$8 sps:$4 sm:$0xff]   ;;  %v1033_v19 = vld [vmem:[#allocation7 + $0x60] ss:$8 sps:$4 sm:$0xff]  }
  0x38   :  { %302 = vmatprep.subr.bf16.mxu0 %v983_v4  ;;  %551 = vmatprep.subr.bf16.mxu1 %v1028_v16  ;;  %v1000_v20 = vld [vmem:[#allocation5] ss:$8 sps:$4 sm:$0xff]   ;;  %v1034_v21 = vld [vmem:[#allocation7 + $0x54] ss:$8 sps:$4 sm:$0xff]   ;;  %v1036_v23 = vld [vmem:[#allocation7 + $0x50] ss:$8 sps:$4 sm:$0xff]  }
  0x39   :  { %552 = vmatpush1.bf16.msra.mxu1 %v1030_v17  ;;  %v1001_v22 = vld [vmem:[#allocation5 + $0xf4] ss:$8 sps:$4 sm:$0xff]   ;;  %v1003_v24 = vld [vmem:[#allocation5 + $0xf0] ss:$8 sps:$4 sm:$0xff]   ;;  %v1037_v25 = vld [vmem:[#allocation7 + $0x44] ss:$8 sps:$4 sm:$0xff]  }
  0x3a   :  { %553 = vmatprep.subr.bf16.mxu1 %v1031_v18  ;;  %v1004_v26 = vld [vmem:[#allocation5 + $0xe4] ss:$8 sps:$4 sm:$0xff]   ;;  %v1039_v27 = vld [vmem:[#allocation7 + $0x40] ss:$8 sps:$4 sm:$0xff]   ;;  %v1040_v29 = vld [vmem:[#allocation7 + $0x34] ss:$8 sps:$4 sm:$0xff]  }
  0x3b   :  { %303 = vmatpush1.bf16.msra.mxu0 %v985_v5  ;;  %v1006_v28 = vld [vmem:[#allocation5 + $0xe0] ss:$8 sps:$4 sm:$0xff]   ;;  %v1007_v30 = vld [vmem:[#allocation5 + $0xd4] ss:$8 sps:$4 sm:$0xff]   ;;  %v1009_v31 = vld [vmem:[#allocation5 + $0xd0] ss:$8 sps:$4 sm:$0xff]  }
  0x3c   :  { %304 = vmatprep.subr.bf16.mxu0 %v986_v6  ;;  %v1042_v32 = vld [vmem:[#allocation7 + $0x30] ss:$8 sps:$4 sm:$0xff]   ;;  %v1010_v33 = vld [vmem:[#allocation5 + $0xc4] ss:$8 sps:$4 sm:$0xff]   ;;  %v1045_v35 = vld [vmem:[#allocation7 + $0x20] ss:$8 sps:$4 sm:$0xff]  }
  0x3d   :  { %554 = vmatpush1.bf16.msra.mxu1 %v1033_v19  ;;  %v1043_v34 = vld [vmem:[#allocation7 + $0x24] ss:$8 sps:$4 sm:$0xff]   ;;  %v1012_v36 = vld [vmem:[#allocation5 + $0xc0] ss:$8 sps:$4 sm:$0xff]   ;;  %v1046_v37 = vld [vmem:[#allocation7 + $0x14] ss:$8 sps:$4 sm:$0xff]  }
  0x3e   :  { %555 = vmatprep.subr.bf16.mxu1 %v1034_v21  ;;  %v1013_v38 = vld [vmem:[#allocation5 + $0xb4] ss:$8 sps:$4 sm:$0xff]   ;;  %v1048_v39 = vld [vmem:[#allocation7 + $0x10] ss:$8 sps:$4 sm:$0xff]   ;;  %v1049_v41 = vld [vmem:[#allocation7 + $0x4] ss:$8 sps:$4 sm:$0xff]  }
  0x3f   :  { %305 = vmatpush1.bf16.msra.mxu0 %v988_v7  ;;  %v1015_v40 = vld [vmem:[#allocation5 + $0xb0] ss:$8 sps:$4 sm:$0xff]   ;;  %v1016_v42 = vld [vmem:[#allocation5 + $0xa4] ss:$8 sps:$4 sm:$0xff]   ;;  %v1051_v43 = vld [vmem:[#allocation7] ss:$8 sps:$4 sm:$0xff]  }
  0x40   :  { %306 = vmatprep.subr.bf16.mxu0 %v989_v8  ;;  %v1018_v44 = vld [vmem:[#allocation5 + $0xa0] ss:$8 sps:$4 sm:$0xff]   ;;  %v1052_v45 = vld [vmem:[#allocation7 + $0xf4] ss:$8 sps:$4 sm:$0xff]   ;;  %v1054_v47 = vld [vmem:[#allocation7 + $0xf0] ss:$8 sps:$4 sm:$0xff]  }
  0x41   :  { %556 = vmatpush1.bf16.msra.mxu1 %v1036_v23  ;;  %v1019_v46 = vld [vmem:[#allocation5 + $0x94] ss:$8 sps:$4 sm:$0xff]   ;;  %v1021_v48 = vld [vmem:[#allocation5 + $0x90] ss:$8 sps:$4 sm:$0xff]   ;;  %v1055_v49 = vld [vmem:[#allocation7 + $0xe4] ss:$8 sps:$4 sm:$0xff]  }
  0x42   :  { %557 = vmatprep.subr.bf16.mxu1 %v1037_v25  ;;  %v1022_v50 = vld [vmem:[#allocation5 + $0x84] ss:$8 sps:$4 sm:$0xff]   ;;  %v1057_v51 = vld [vmem:[#allocation7 + $0xe0] ss:$8 sps:$4 sm:$0xff]   ;;  %v1058_v53 = vld [vmem:[#allocation7 + $0xd4] ss:$8 sps:$4 sm:$0xff]  }
  0x43   :  { %307 = vmatpush1.bf16.msra.mxu0 %v991_v9  ;;  %v1024_v52 = vld [vmem:[#allocation5 + $0x80] ss:$8 sps:$4 sm:$0xff]   ;;  %v1025_v54 = vld [vmem:[#allocation2] ss:$8 sps:$4 sm:$0xff]   ;;  %v1061_v56 = vld [vmem:[#allocation7 + $0xc4] ss:$8 sps:$4 sm:$0xff]  }
  0x44   :  { %308 = vmatprep.subr.bf16.mxu0 %v992_v10  ;;  %v1060_v55 = vld [vmem:[#allocation7 + $0xd0] ss:$8 sps:$4 sm:$0xff]   ;;  %v1063_v57 = vld [vmem:[#allocation7 + $0xc0] ss:$8 sps:$4 sm:$0xff]   ;;  %v1064_v58 = vld [vmem:[#allocation7 + $0xb4] ss:$8 sps:$4 sm:$0xff]  }
  0x45   :  { %558 = vmatpush1.bf16.msra.mxu1 %v1039_v27  ;;  %v1066_v59 = vld [vmem:[#allocation7 + $0xb0] ss:$8 sps:$4 sm:$0xff]   ;;  %v1067_v60 = vld [vmem:[#allocation7 + $0xa4] ss:$8 sps:$4 sm:$0xff]   ;;  %v1069_v61 = vld [vmem:[#allocation7 + $0xa0] ss:$8 sps:$4 sm:$0xff]  }
  0x46   :  { %559 = vmatprep.subr.bf16.mxu1 %v1040_v29  ;;  %v1070_v62 = vld [vmem:[#allocation7 + $0x94] ss:$8 sps:$4 sm:$0xff]   ;;  %v1072_v63 = vld [vmem:[#allocation7 + $0x90] ss:$8 sps:$4 sm:$0xff]   ;;  %v1073_v0 = vld [vmem:[#allocation7 + $0x84] ss:$8 sps:$4 sm:$0xff]  }
  0x47   :  { %309 = vmatpush1.bf16.msra.mxu0 %v994_v11  ;;  %v1075_v1 = vld [vmem:[#allocation7 + $0x80] ss:$8 sps:$4 sm:$0xff]   ;;  %v1076_v2 = vld [vmem:[#allocation8 + $0x70] ss:$8 sps:$4 sm:$0xff]   ;;  %v1078_v3 = vld [vmem:[#allocation8 + $0x74] ss:$8 sps:$4 sm:$0xff]  }
  0x48   :  { %310 = vmatprep.subr.bf16.mxu0 %v995_v12  ;;  %v1081_v4 = vld [vmem:[#allocation8 + $0x64] ss:$8 sps:$4 sm:$0xff]   ;;  %v1079_v5 = vld [vmem:[#allocation8 + $0x60] ss:$8 sps:$4 sm:$0xff]   ;;  %v1084_v6 = vld [vmem:[#allocation8 + $0x54] ss:$8 sps:$4 sm:$0xff]  }
  0x49   :  { %560 = vmatpush1.bf16.msra.mxu1 %v1042_v32  ;;  %v1082_v7 = vld [vmem:[#allocation8 + $0x50] ss:$8 sps:$4 sm:$0xff]   ;;  %v1087_v8 = vld [vmem:[#allocation8 + $0x44] ss:$8 sps:$4 sm:$0xff]   ;;  %v1085_v9 = vld [vmem:[#allocation8 + $0x40] ss:$8 sps:$4 sm:$0xff]  }
  0x4a   :  { %561 = vmatprep.subr.bf16.mxu1 %v1043_v34  ;;  %v1090_v10 = vld [vmem:[#allocation8 + $0x34] ss:$8 sps:$4 sm:$0xff]   ;;  %v1088_v11 = vld [vmem:[#allocation8 + $0x30] ss:$8 sps:$4 sm:$0xff]   ;;  %v1093_v12 = vld [vmem:[#allocation8 + $0x24] ss:$8 sps:$4 sm:$0xff]  }
  0x4b   :  { %311 = vmatpush1.bf16.msra.mxu0 %v997_v13  ;;  %v1091_v13 = vld [vmem:[#allocation8 + $0x20] ss:$8 sps:$4 sm:$0xff]   ;;  %v1094_v15 = vld [vmem:[#allocation8 + $0x10] ss:$8 sps:$4 sm:$0xff]   ;;  %v1099_v16 = vld [vmem:[#allocation8 + $0x4] ss:$8 sps:$4 sm:$0xff]  }
  0x4c   :  { %312 = vmatprep.subr.bf16.mxu0 %v998_v14  ;;  %v1096_v14 = vld [vmem:[#allocation8 + $0x14] ss:$8 sps:$4 sm:$0xff]   ;;  %v1097_v17 = vld [vmem:[#allocation8] ss:$8 sps:$4 sm:$0xff]   ;;  %v1100_v19 = vld [vmem:[#allocation8 + $0xf0] ss:$8 sps:$4 sm:$0xff]  }
  0x4d   :  { %562 = vmatpush1.bf16.msra.mxu1 %v1045_v35  ;;  %v1102_v18 = vld [vmem:[#allocation8 + $0xf4] ss:$8 sps:$4 sm:$0xff]   ;;  %v1103_v21 = vld [vmem:[#allocation8 + $0xe0] ss:$8 sps:$4 sm:$0xff]   ;;  %v1106_v23 = vld [vmem:[#allocation8 + $0xd0] ss:$8 sps:$4 sm:$0xff]  }
  0x4e   :  { %563 = vmatprep.subr.bf16.mxu1 %v1046_v37  ;;  %v1109_v25 = vld [vmem:[#allocation8 + $0xc0] ss:$8 sps:$4 sm:$0xff]   ;;  %v1112_v27 = vld [vmem:[#allocation8 + $0xb0] ss:$8 sps:$4 sm:$0xff]   ;;  %s1238_s23 = smov [#allocation10]  }
  0x4f   :  { %313 = vmatpush1.bf16.msra.mxu0 %v1000_v20  ;;  %v1105_v20 = vld [vmem:[#allocation8 + $0xe4] ss:$8 sps:$4 sm:$0xff]   ;;  %v116_v32 = vld [vmem:[%s1319_s2] sm:$0x3]  ;;  %s856_s24 = sshll.u32 %s1238_s23, 4  ;;  %s857_s24 = int_to_ptr.vmem [resolvable:$true] %s856_s24 }
  0x50   :  { %314 = vmatprep.subr.bf16.mxu0 %v1001_v22  ;;  %v1108_v22 = vld [vmem:[#allocation8 + $0xd4] ss:$8 sps:$4 sm:$0xff]   ;;  %s1204_s25 = scalar_lea.vmem %s857_s24, 512  ;;  %p1209_p7 = scmp.lt.s32.totalorder %s857_s24, %s857_s24 }
  0x51   :  { %564 = vmatpush1.bf16.msra.mxu1 %v1048_v39  ;;  %p1205_p6 = scmp.ne.s32.totalorder %s857_s24, %s1204_s25  ;;  %p1210_p8 = scmp.lt.s32.totalorder %s1204_s25, %s1204_s25 }
  0x52   :  { %565 = vmatprep.subr.bf16.mxu1 %v1049_v41 }
  0x53   :  { %315 = vmatpush2.bf16.msra.mxu0 %v1003_v24  ;;  %v1111_v24 = vld [vmem:[#allocation8 + $0xc4] ss:$8 sps:$4 sm:$0xff]   ;;  %p1211_p9 = por %p1210_p8, %p1209_p7 }
  0x54   :  { %316 = vmatprep.subr.bf16.mxu0 %v1004_v26  ;;  %v1114_v26 = vld [vmem:[#allocation8 + $0xb4] ss:$8 sps:$4 sm:$0xff]  }
  0x55   :  { %566 = vmatpush1.bf16.msra.mxu1 %v1051_v43  ;;  %p1212_p10 = pnand %p1211_p9, %p1205_p6 }
  0x56   :  { %567 = vmatprep.subr.bf16.mxu1 %v1052_v45 }
  0x57   :  { %317 = vmatpush2.bf16.msra.mxu0 %v1006_v28  ;;  %v118_v28 = vlaneseq }
  0x58   :  { %318 = vmatprep.subr.bf16.mxu0 %v1007_v30 }
  0x59   :  { %568 = vmatpush2.bf16.msra.mxu1 %v1054_v47  ;;  %v119_v29 = vshrl.u32 %v118_v28, 7 }
  0x5a   :  { %569 = vmatprep.subr.bf16.mxu1 %v1055_v49  ;;  %v1117_v49 = vld [vmem:[#allocation8 + $0xa4] ss:$8 sps:$4 sm:$0xff]  }
  0x5b   :  { %319 = vmatpush2.bf16.msra.mxu0 %v1009_v31  ;;  %v124_v30 = vsub.s32 1, %v119_v29  ;;  %v120_v31 = vsub.s32 0, %v119_v29 }
  0x5c   :  { %320 = vmatprep.subr.bf16.mxu0 %v1010_v33 }
  0x5d   :  { %570 = vmatpush2.bf16.msra.mxu1 %v1057_v51  ;;  %v125_v34 = vrot.slane %v116_v32, %v124_v30  ;;  %v121_v35 = vrot.slane %v116_v32, %v120_v31  ;;  %v1120_v51 = vld [vmem:[#allocation8 + $0x94] ss:$8 sps:$4 sm:$0xff]  }
  0x5e   :  { %571 = vmatprep.subr.bf16.mxu1 %v1058_v53  ;;  %v1123_v53 = vld [vmem:[#allocation8 + $0x84] ss:$8 sps:$4 sm:$0xff]  }
  0x5f   :  { %321 = vmatpush2.bf16.msra.mxu0 %v1012_v36 }
  0x60   :  { %322 = vmatprep.subr.bf16.mxu0 %v1013_v38 }
  0x61   :  { %572 = vmatpush2.bf16.msra.mxu1 %v1060_v55  ;;  %v379_v55 = vld [vmem:[%s1321_s4] sm:$0x3] }
  0x62   :  { %573 = vmatprep.subr.bf16.mxu1 %v1061_v56 }
  0x63   :  { %323 = vmatpush2.bf16.msra.mxu0 %v1015_v40 }
  0x64   :  { %324 = vmatprep.subr.bf16.mxu0 %v1016_v42 }
  0x65   :  { %574 = vmatpush2.bf16.msra.mxu1 %v1063_v57  ;;  %v388_v57 = vrot.slane %v379_v55, %v124_v30 }
  0x66   :  { %575 = vmatprep.subr.bf16.mxu1 %v1064_v58  ;;  %v384_v58 = vrot.slane %v379_v55, %v120_v31 }
  0x67   :  { %325 = vmatpush2.bf16.msra.mxu0 %v1018_v44 }
  0x68   :  { %326 = vmatprep.subr.bf16.mxu0 %v1019_v46 }
  0x69   :  { %576 = vmatpush2.bf16.msra.mxu1 %v1066_v59 }
  0x6a   :  { %577 = vmatprep.subr.bf16.mxu1 %v1067_v60 }
  0x6b   :  { %327 = vmatpush2.bf16.msra.mxu0 %v1021_v48 }
  0x6c   :  { %328 = vmatprep.subr.bf16.mxu0 %v1022_v50  ;;  %v1115_v50 = vld [vmem:[#allocation8 + $0xa0] ss:$8 sps:$4 sm:$0xff]  }
  0x6d   :  { %578 = vmatpush2.bf16.msra.mxu1 %v1069_v61 }
  0x6e   :  { %579 = vmatprep.subr.bf16.mxu1 %v1070_v62 }
  0x6f   :  { %329 = vmatpush2.bf16.msra.mxu0 %v1024_v52  ;;  %v1118_v52 = vld [vmem:[#allocation8 + $0x90] ss:$8 sps:$4 sm:$0xff]  }
  0x70   :  { %804 = vmatprep.subr.bf16.mxu0 %v1078_v3 }
  0x71   :  { %580 = vmatpush2.bf16.msra.mxu1 %v1072_v63 }
  0x72   :  { %331 = vmatmul.mubr.bf16.vlgmr.msra.gmra.mxu0 %v1025_v54  ;;  %581 = vmatprep.subr.bf16.mxu1 %v1073_v0  ;;  %v1121_v54 = vld [vmem:[#allocation8 + $0x80] ss:$8 sps:$4 sm:$0xff]  }
  0x73   :  { %805 = vmatpush1.bf16.msra.mxu0 %v1076_v2 }
  0x74   :  { %806 = vmatprep.subr.bf16.mxu0 %v1081_v4 }
  0x75   :  { %582 = vmatpush2.bf16.msra.mxu1 %v1075_v1 }
  0x77   :  { %807 = vmatpush1.bf16.msra.mxu0 %v1079_v5 }
  0x78   :  { %808 = vmatprep.subr.bf16.mxu0 %v1084_v6 }
  0x7b   :  { %809 = vmatpush1.bf16.msra.mxu0 %v1082_v7 }
  0x7c   :  { %810 = vmatprep.subr.bf16.mxu0 %v1087_v8  ;;  %v632_v8 = vld [vmem:[%s1323_s6] sm:$0x3] }
  0x7f   :  { %811 = vmatpush1.bf16.msra.mxu0 %v1085_v9  ;;  %v637_v9 = vrot.slane %v632_v8, %v120_v31 }
  0x80   :  { %812 = vmatprep.subr.bf16.mxu0 %v1090_v10  ;;  %v641_v10 = vrot.slane %v632_v8, %v124_v30 }
  0x83   :  { %813 = vmatpush1.bf16.msra.mxu0 %v1088_v11 }
  0x84   :  { %814 = vmatprep.subr.bf16.mxu0 %v1093_v12 }
  0x87   :  { %815 = vmatpush1.bf16.msra.mxu0 %v1091_v13 }
  0x88   :  { %816 = vmatprep.subr.bf16.mxu0 %v1096_v14 }
  0x8b   :  { %817 = vmatpush1.bf16.msra.mxu0 %v1094_v15 }
  0x8c   :  { %818 = vmatprep.subr.bf16.mxu0 %v1099_v16 }
  0x8f   :  { %819 = vmatpush1.bf16.msra.mxu0 %v1097_v17 }
  0x90   :  { %820 = vmatprep.subr.bf16.mxu0 %v1102_v18 }
  0x93   :  { %821 = vmatpush2.bf16.msra.mxu0 %v1100_v19 }
  0x94   :  { %822 = vmatprep.subr.bf16.mxu0 %v1105_v20 }
  0x97   :  { %823 = vmatpush2.bf16.msra.mxu0 %v1103_v21 }
  0x98   :  { %824 = vmatprep.subr.bf16.mxu0 %v1108_v22 }
  0x9b   :  { %825 = vmatpush2.bf16.msra.mxu0 %v1106_v23 }
  0x9c   :  { %826 = vmatprep.subr.bf16.mxu0 %v1111_v24 }
  0x9f   :  { %827 = vmatpush2.bf16.msra.mxu0 %v1109_v25 }
  0xa0   :  { %828 = vmatprep.subr.bf16.mxu0 %v1114_v26 }
  0xa3   :  { %829 = vmatpush2.bf16.msra.mxu0 %v1112_v27 }
  0xa4   :  { %830 = vmatprep.subr.bf16.mxu0 %v1117_v49 }
  0xa7   :  { %831 = vmatpush2.bf16.msra.mxu0 %v1115_v50 }
  0xa8   :  { %832 = vmatprep.subr.bf16.mxu0 %v1120_v51 }
  0xab   :  { %833 = vmatpush2.bf16.msra.mxu0 %v1118_v52 }
  0xac   :  { %834 = vmatprep.subr.bf16.mxu0 %v1123_v53 }
  0xaf   :  { %835 = vmatpush2.bf16.msra.mxu0 %v1121_v54 }
 0x132   :  { %v332_v33 = vpop.f32.mrf.mxu0 }
 0x133   :  { %v333_v40 = vadd.f32 %v332_v33, %v121_v35 }
 0x134   :  { %v334_v36 = vpop.f32.mrf.mxu0 }
 0x135   :  { %v335_v38 = vadd.f32 %v334_v36, %v125_v34  ;;  %v341_v46 = vmax.f32 %v333_v40, 0.0 }
 0x136   :  { %v336_v37 = vpop.f32.mrf.mxu0 }
 0x137   :  { %v337_v39 = vadd.f32 %v336_v37, %v121_v35  ;;  %v342_v44 = vmax.f32 %v335_v38, 0.0 }
 0x138   :  { %v338_v41 = vpop.f32.mrf.mxu0 }
 0x139   :  { %v339_v42 = vadd.f32 %v338_v41, %v125_v34  ;;  %v343_v43 = vmax.f32 %v337_v39, 0.0 }
 0x13b   :  { %v344_v45 = vmax.f32 %v339_v42, 0.0  ;;  %v345_v48 = vpack.c.bf16 %v343_v43, %v341_v46 }
 0x13d   :  { %v346_v47 = vpack.c.bf16 %v344_v45, %v342_v44 }
 0x13f   :  { %583 = vmatprep.mubr.bf16.mxu1 %v346_v47 }
 0x140   :  { %584 = vmatmul.mubr.bf16.vlgmr.msra.gmra.mxu1 %v345_v48 }
 0x200   :  { %v585_v56 = vpop.f32.mrf.mxu1 }
 0x201   :  { %v586_v63 = vadd.f32 %v585_v56, %v384_v58 }
 0x202   :  { %v587_v59 = vpop.f32.mrf.mxu1 }
 0x203   :  { %v588_v61 = vadd.f32 %v587_v59, %v388_v57  ;;  %v594_v5 = vmax.f32 %v586_v63, 0.0 }
 0x204   :  { %v589_v60 = vpop.f32.mrf.mxu1 }
 0x205   :  { %v590_v62 = vadd.f32 %v589_v60, %v384_v58  ;;  %v595_v3 = vmax.f32 %v588_v61, 0.0 }
 0x206   :  { %v591_v0 = vpop.f32.mrf.mxu1 }
 0x207   :  { %v592_v1 = vadd.f32 %v591_v0, %v388_v57  ;;  %v596_v2 = vmax.f32 %v590_v62, 0.0 }
 0x209   :  { %v597_v4 = vmax.f32 %v592_v1, 0.0  ;;  %v598_v7 = vpack.c.bf16 %v596_v2, %v594_v5 }
 0x20b   :  { %v599_v6 = vpack.c.bf16 %v597_v4, %v595_v3 }
 0x20d   :  { %836 = vmatprep.mubr.bf16.mxu0 %v599_v6 }
 0x20e   :  { %837 = vmatmul.mubr.bf16.vlgmr.msra.gmra.mxu0 %v598_v7 }
 0x2ce   :  { %v838_v11 = vpop.f32.mrf.mxu0 }
 0x2cf   :  { %v839_v12 = vadd.f32 %v838_v11, %v637_v9 }
 0x2d0   :  { %v840_v13 = vpop.f32.mrf.mxu0 }
 0x2d1   :  { %847 = vst [vmem:[#allocation10] sm:$0xff] %v839_v12  ;;  %v841_v14 = vadd.f32 %v840_v13, %v641_v10 }
 0x2d2   :  { %v842_v15 = vpop.f32.mrf.mxu0 }
 0x2d3   :  { %848 = vst [vmem:[#allocation10 + $0x8] sm:$0xff] %v841_v14  ;;  %v843_v16 = vadd.f32 %v842_v15, %v637_v9 }
 0x2d4   :  { %v844_v17 = vpop.f32.mrf.mxu0 }
 0x2d5   :  { %849 = vst [vmem:[#allocation10 + $0x10] sm:$0xff] %v843_v16  ;;  %v845_v18 = vadd.f32 %v844_v17, %v641_v10 }
 0x2d7   :  { %850 = vst [vmem:[#allocation10 + $0x18] sm:$0xff] %v845_v18 }
 0x2d8   :  { %1215 = shalt.err (!%p1212_p10)
}
 0x2d9   :  { %s1239_s6 = smov 256   ;;  %s1240_s26 = smov 16  }
 0x2da   :  { %862 = dma.vmem_to_hbm [thread:$0]  %s857_s24, 512, %s1324_s7, [#allocation4], %s1239_s6, %s1239_s6, %s1240_s26  }
 0x2db   :  { %1230 = dma.done.wait [#allocation4], 512  }
 0x2dc   :  { %1231 = vsyncadd [#allocation4], 4294966784 }
 0x2dd   :  { %866 = vsyncpa [#allocation3], 1 }
 0x2de   :  { %867 = vsyncpa [#allocation6], 1 }
 0x2df   :  { %868 = vsyncpa [#allocation9], 1 }
 0x2e0   :  { %869 = vsyncpa [#allocation4], 1 }

</bundles_post_ra>
